<compile_context>
chip_gen: v5e
topology: v5e:2x2
jax: 0.10.0
libtpu: 0.0.40
codegen_flags: <defaults>
</compile_context>

<pallas_src>
import functools

import jax
import jax.numpy as jnp
from jax.experimental import pallas as pl
from jax.experimental.pallas import tpu as pltpu


def _round_up(x: int, m: int) -> int:
    return ((x + m - 1) // m) * m


def _policy_kernel(obs_ref, w1_ref, w2_ref, w3_ref, b_ref,
                   logits_ref, probs_ref, *, h1, h2):
    # Static lane-slices of the concatenated bias row (all within one VMEM tile).
    b1 = b_ref[:, :h1]
    b2 = b_ref[:, h1:h1 + h2]
    b3 = b_ref[:, h1 + h2:]

    # Hidden layer 1: relu(obs @ W1 + b1)
    h = jnp.dot(obs_ref[...], w1_ref[...], preferred_element_type=jnp.float32)
    h = jnp.maximum(h + b1, 0.0)
    # Hidden layer 2: relu(h @ W2 + b2)
    h = jnp.dot(h, w2_ref[...], preferred_element_type=jnp.float32)
    h = jnp.maximum(h + b2, 0.0)
    # Output layer (ReLU applied here too -- matches mlp_factory exactly)
    raw = jnp.dot(h, w3_ref[...], preferred_element_type=jnp.float32)
    raw = jnp.maximum(raw + b3, 0.0)

    # Categorical(logits=raw): one exp pass reused for both logits and probs.
    m = jnp.max(raw, axis=-1, keepdims=True)
    shifted = raw - m
    s = jnp.exp(shifted)                              # EUP, single full-width pass
    denom = jnp.sum(s, axis=-1, keepdims=True)        # (tb, 1)
    inv_denom = 1.0 / denom                           # per-row divide, cheap & exact

    # One full-ref store per output (no partial-slice writes, no packed slab).
    logits_ref[...] = shifted - jnp.log(denom)
    probs_ref[...] = s * inv_denom


@functools.partial(jax.jit, static_argnames=("tile_b",))
def discrete_policy_forward(obs, params, *, tile_b: int = 2048):
    """Whole MLP + categorical normalization in one gridded Pallas kernel.

    Returns (normalized_logits, probs), each (batch, act_dim) float32.
    tile_b: batch rows per grid step (2048-4096 is the HBM-roofline sweet spot).
    """
    w1, w2, w3 = params["w1"], params["w2"], params["w3"]
    b_all = jnp.concatenate([params["b1"], params["b2"], params["b3"]], axis=-1)
    obs = obs.astype(jnp.float32)
    batch, obs_dim = obs.shape
    h1, h2, act_dim = w1.shape[1], w2.shape[1], w3.shape[1]

    # Batch tile: multiple of 8 sublanes, capped at tile_b.  Ensure >= 2 grid steps
    # whenever the batch allows, so both v7x TensorCores get work.
    padded8 = _round_up(max(batch, 1), 8)
    tb = min(_round_up(tile_b, 8), padded8)
    if pl.cdiv(padded8, tb) < 2 and padded8 > 8:
        tb = _round_up(pl.cdiv(padded8, 2), 8)
    padded_batch = _round_up(batch, tb)
    if padded_batch != batch:
        obs = jnp.pad(obs, ((0, padded_batch - batch), (0, 0)))
    grid = (padded_batch // tb,)

    # obs / outputs tiled over batch; weights & bias VMEM-resident (constant map).
    obs_spec = pl.BlockSpec((tb, obs_dim), lambda i: (i, 0))
    out_spec = pl.BlockSpec((tb, act_dim), lambda i: (i, 0))

    def const_spec(arr):
        return pl.BlockSpec(arr.shape, lambda i: (0, 0))

    flops = 2 * padded_batch * (obs_dim * h1 + h1 * h2 + h2 * act_dim)
    transcendentals = padded_batch * (act_dim + 2)      # exp row + log + reciprocal
    weight_bytes = 4 * (w1.size + w2.size + w3.size + b_all.size)
    bytes_accessed = 4 * padded_batch * (obs_dim + 2 * act_dim) + int(weight_bytes)

    logits, probs = pl.pallas_call(
        functools.partial(_policy_kernel, h1=h1, h2=h2),
        out_shape=(jax.ShapeDtypeStruct((padded_batch, act_dim), jnp.float32),
                   jax.ShapeDtypeStruct((padded_batch, act_dim), jnp.float32)),
        grid=grid,
        in_specs=[obs_spec,
                  const_spec(w1), const_spec(w2), const_spec(w3),
                  const_spec(b_all)],
        out_specs=[out_spec, out_spec],
        compiler_params=pltpu.CompilerParams(
            dimension_semantics=("parallel",),
            # Above v5e's 16 MiB / v6e-v7x's 32 MiB scoped defaults, below v7x's
            # 64 MiB physical; actual usage at tb=2048 is ~10 MiB (lane-padded).
            vmem_limit_bytes=48 * 1024 * 1024),
        cost_estimate=pl.CostEstimate(
            flops=int(flops),
            transcendentals=int(transcendentals),
            bytes_accessed=int(bytes_accessed)),
    )(obs, w1, w2, w3, b_all)

    if padded_batch != batch:
        logits = logits[:batch]
        probs = probs[:batch]
    return logits, probs


def init_params(key, obs_dim, hidden_sizes, act_dim):
    """Deterministic PyTorch-like Linear init: U(-1/sqrt(fan_in), 1/sqrt(fan_in))."""
    sizes = [obs_dim] + list(hidden_sizes) + [act_dim]
    params = {}
    for idx in range(len(sizes) - 1):
        fan_in, fan_out = sizes[idx], sizes[idx + 1]
        key, kw, kb = jax.random.split(key, 3)
        bound = 1.0 / jnp.sqrt(jnp.float32(fan_in))
        params[f"w{idx + 1}"] = jax.random.uniform(
            kw, (fan_in, fan_out), jnp.float32, -bound, bound)
        params[f"b{idx + 1}"] = jax.random.uniform(
            kb, (1, fan_out), jnp.float32, -bound, bound)
    return params


def _reference_forward(obs, params):
    h = jnp.maximum(obs @ params["w1"] + params["b1"], 0.0)
    h = jnp.maximum(h @ params["w2"] + params["b2"], 0.0)
    raw = jnp.maximum(h @ params["w3"] + params["b3"], 0.0)
    lse = jax.scipy.special.logsumexp(raw, axis=-1, keepdims=True)
    return raw - lse, jax.nn.softmax(raw, axis=-1)


if __name__ == "__main__":
    # Shapes consistent with the module: obs_dim=16, hidden=[32, 32], act_dim=8.
    obs_dim, hidden_sizes, act_dim = 16, [32, 32], 8

    key = jax.random.PRNGKey(0)
    key, k_obs = jax.random.split(key)
    params = init_params(key, obs_dim, hidden_sizes, act_dim)

    # Small batch: single tile, no padding.
    obs = jax.random.normal(k_obs, (8, obs_dim), jnp.float32)
    logits, probs = discrete_policy_forward(obs, params)
    jax.block_until_ready((logits, probs))
    ref_logits, ref_probs = _reference_forward(obs, params)
    assert logits.shape == (8, act_dim) and probs.shape == (8, act_dim)
    assert jnp.allclose(logits, ref_logits, atol=1e-5, rtol=1e-5), "logits mismatch"
    assert jnp.allclose(probs, ref_probs, atol=1e-5, rtol=1e-5), "probs mismatch"
    assert jnp.allclose(jnp.sum(probs, axis=-1), 1.0, atol=1e-5), "probs not normalized"

    # Medium batch: exercises the >=2-tile split + row padding (1000 -> 2 x 504).
    key, k_med = jax.random.split(key)
    obs_med = jax.random.normal(k_med, (1000, obs_dim), jnp.float32)
    logits_m, probs_m = discrete_policy_forward(obs_med, params)
    jax.block_until_ready((logits_m, probs_m))
    ref_logits_m, ref_probs_m = _reference_forward(obs_med, params)
    assert logits_m.shape == (1000, act_dim)
    assert jnp.allclose(logits_m, ref_logits_m, atol=1e-5, rtol=1e-5), "med logits mismatch"
    assert jnp.allclose(probs_m, ref_probs_m, atol=1e-5, rtol=1e-5), "med probs mismatch"

    # Larger batch on the fat-tile path (4096 -> 2 x 2048, no padding, no wrapper slice).
    key, k_big = jax.random.split(key)
    obs_big = jax.random.normal(k_big, (4096, obs_dim), jnp.float32)
    logits_b, probs_b = discrete_policy_forward(obs_big, params)
    jax.block_until_ready((logits_b, probs_b))
    ref_logits_b, ref_probs_b = _reference_forward(obs_big, params)
    assert logits_b.shape == (4096, act_dim)
    assert jnp.allclose(logits_b, ref_logits_b, atol=1e-5, rtol=1e-5), "big logits mismatch"
    assert jnp.allclose(probs_b, ref_probs_b, atol=1e-5, rtol=1e-5), "big probs mismatch"

    print("KERNEL_OK")
</pallas_src>

<mosaic_0001>
module attributes {stable_mosaic.version = 11 : i64} {
  func.func @_policy_kernel(%arg0: i32, %arg1: memref<8x16xf32, #tpu.memory_space<vmem>>, %arg2: memref<16x32xf32, #tpu.memory_space<vmem>>, %arg3: memref<32x32xf32, #tpu.memory_space<vmem>>, %arg4: memref<32x8xf32, #tpu.memory_space<vmem>>, %arg5: memref<1x72xf32, #tpu.memory_space<vmem>>, %arg6: memref<8x8xf32, #tpu.memory_space<vmem>>, %arg7: memref<8x8xf32, #tpu.memory_space<vmem>>) attributes {dimension_semantics = [#tpu.dimension_semantics<parallel>], iteration_bounds = array<i64: 1>, scalar_prefetch = 0 : i64, scratch_operands = 0 : i64, tpu.core_type = #tpu.core_type<tc>, window_params = [{transform_indices = @transform_0, window_bounds = array<i64: 8, 16>}, {pipeline_mode = #tpu.pipeline_mode<synchronous>, transform_indices = @transform_1, window_bounds = array<i64: 16, 32>}, {pipeline_mode = #tpu.pipeline_mode<synchronous>, transform_indices = @transform_2, window_bounds = array<i64: 32, 32>}, {pipeline_mode = #tpu.pipeline_mode<synchronous>, transform_indices = @transform_3, window_bounds = array<i64: 32, 8>}, {pipeline_mode = #tpu.pipeline_mode<synchronous>, transform_indices = @transform_4, window_bounds = array<i64: 1, 72>}, {transform_indices = @transform_5, window_bounds = array<i64: 8, 8>}, {transform_indices = @transform_6, window_bounds = array<i64: 8, 8>}]} {
    %c0 = arith.constant 0 : index
    %c0_0 = arith.constant 0 : index
    %0 = vector.load %arg5[%c0, %c0_0] : memref<1x72xf32, #tpu.memory_space<vmem>>, vector<1x32xf32>
    %c0_1 = arith.constant 0 : index
    %c32 = arith.constant 32 : index
    %1 = vector.load %arg5[%c0_1, %c32] : memref<1x72xf32, #tpu.memory_space<vmem>>, vector<1x32xf32>
    %c0_2 = arith.constant 0 : index
    %c64 = arith.constant 64 : index
    %2 = vector.load %arg5[%c0_2, %c64] : memref<1x72xf32, #tpu.memory_space<vmem>>, vector<1x8xf32>
    %c0_3 = arith.constant 0 : index
    %c0_4 = arith.constant 0 : index
    %3 = vector.load %arg1[%c0_3, %c0_4] : memref<8x16xf32, #tpu.memory_space<vmem>>, vector<8x16xf32>
    %c0_5 = arith.constant 0 : index
    %c0_6 = arith.constant 0 : index
    %4 = vector.load %arg2[%c0_5, %c0_6] : memref<16x32xf32, #tpu.memory_space<vmem>>, vector<16x32xf32>
    %cst = arith.constant dense<0.000000e+00> : vector<8x32xf32>
    %5 = tpu.matmul %3, %4, %cst {dimension_numbers = #tpu.dot_dimension_numbers<[1], [0], [0], [1], [0, 0, 1, 1], [], []>} : vector<8x16xf32>, vector<16x32xf32>, vector<8x32xf32> -> vector<8x32xf32>
    %6 = vector.broadcast %0 : vector<1x32xf32> to vector<8x32xf32>
    %7 = arith.addf %5, %6 : vector<8x32xf32>
    %cst_7 = arith.constant 0.000000e+00 : f32
    %8 = vector.broadcast %cst_7 : f32 to vector<8x32xf32>
    %9 = arith.maximumf %7, %8 : vector<8x32xf32>
    %c0_8 = arith.constant 0 : index
    %c0_9 = arith.constant 0 : index
    %10 = vector.load %arg3[%c0_8, %c0_9] : memref<32x32xf32, #tpu.memory_space<vmem>>, vector<32x32xf32>
    %cst_10 = arith.constant dense<0.000000e+00> : vector<8x32xf32>
    %11 = tpu.matmul %9, %10, %cst_10 {dimension_numbers = #tpu.dot_dimension_numbers<[1], [0], [0], [1], [0, 0, 1, 1], [], []>} : vector<8x32xf32>, vector<32x32xf32>, vector<8x32xf32> -> vector<8x32xf32>
    %12 = vector.broadcast %1 : vector<1x32xf32> to vector<8x32xf32>
    %13 = arith.addf %11, %12 : vector<8x32xf32>
    %cst_11 = arith.constant 0.000000e+00 : f32
    %14 = vector.broadcast %cst_11 : f32 to vector<8x32xf32>
    %15 = arith.maximumf %13, %14 : vector<8x32xf32>
    %c0_12 = arith.constant 0 : index
    %c0_13 = arith.constant 0 : index
    %16 = vector.load %arg4[%c0_12, %c0_13] : memref<32x8xf32, #tpu.memory_space<vmem>>, vector<32x8xf32>
    %cst_14 = arith.constant dense<0.000000e+00> : vector<8x8xf32>
    %17 = tpu.matmul %15, %16, %cst_14 {dimension_numbers = #tpu.dot_dimension_numbers<[1], [0], [0], [1], [0, 0, 1, 1], [], []>} : vector<8x32xf32>, vector<32x8xf32>, vector<8x8xf32> -> vector<8x8xf32>
    %18 = vector.broadcast %2 : vector<1x8xf32> to vector<8x8xf32>
    %19 = arith.addf %17, %18 : vector<8x8xf32>
    %cst_15 = arith.constant 0.000000e+00 : f32
    %20 = vector.broadcast %cst_15 : f32 to vector<8x8xf32>
    %21 = arith.maximumf %19, %20 : vector<8x8xf32>
    %cst_16 = arith.constant dense<0xFF800000> : vector<8xf32>
    %22 = vector.multi_reduction <maximumf>, %21, %cst_16 [1] : vector<8x8xf32> to vector<8xf32>
    %23 = vector.shape_cast %22 : vector<8xf32> to vector<8x1xf32>
    %24 = vector.broadcast %23 : vector<8x1xf32> to vector<8x8xf32>
    %25 = arith.subf %21, %24 : vector<8x8xf32>
    %26 = math.exp %25 : vector<8x8xf32>
    %cst_17 = arith.constant dense<0.000000e+00> : vector<8xf32>
    %27 = vector.multi_reduction <add>, %26, %cst_17 [1] : vector<8x8xf32> to vector<8xf32>
    %28 = vector.shape_cast %27 : vector<8xf32> to vector<8x1xf32>
    %cst_18 = arith.constant 1.000000e+00 : f32
    %29 = vector.broadcast %cst_18 : f32 to vector<8x1xf32>
    %30 = arith.divf %29, %28 : vector<8x1xf32>
    %31 = math.log %28 : vector<8x1xf32>
    %32 = vector.broadcast %31 : vector<8x1xf32> to vector<8x8xf32>
    %33 = arith.subf %25, %32 : vector<8x8xf32>
    %c0_19 = arith.constant 0 : index
    %c0_20 = arith.constant 0 : index
    %34 = vector.load %arg6[%c0_19, %c0_20] : memref<8x8xf32, #tpu.memory_space<vmem>>, vector<8x8xf32>
    tpu.vector_store %arg6[%c0_19, %c0_20], %33 {strides = array<i32>} : memref<8x8xf32, #tpu.memory_space<vmem>>, vector<8x8xf32>,
    %35 = vector.broadcast %30 : vector<8x1xf32> to vector<8x8xf32>
    %36 = arith.mulf %26, %35 : vector<8x8xf32>
    %c0_21 = arith.constant 0 : index
    %c0_22 = arith.constant 0 : index
    %37 = vector.load %arg7[%c0_21, %c0_22] : memref<8x8xf32, #tpu.memory_space<vmem>>, vector<8x8xf32>
    tpu.vector_store %arg7[%c0_21, %c0_22], %36 {strides = array<i32>} : memref<8x8xf32, #tpu.memory_space<vmem>>, vector<8x8xf32>,
    return
  }
  func.func @transform_0(%arg0: i32) -> (i32, i32) {
    %c0_i32 = arith.constant 0 : i32
    %c0_i32_0 = arith.constant 0 : i32
    return %arg0, %c0_i32 : i32, i32
  }
  func.func @transform_1(%arg0: i32) -> (i32, i32) {
    %c0_i32 = arith.constant 0 : i32
    %c0_i32_0 = arith.constant 0 : i32
    %c0_i32_1 = arith.constant 0 : i32
    return %c0_i32, %c0_i32_0 : i32, i32
  }
  func.func @transform_2(%arg0: i32) -> (i32, i32) {
    %c0_i32 = arith.constant 0 : i32
    %c0_i32_0 = arith.constant 0 : i32
    %c0_i32_1 = arith.constant 0 : i32
    return %c0_i32, %c0_i32_0 : i32, i32
  }
  func.func @transform_3(%arg0: i32) -> (i32, i32) {
    %c0_i32 = arith.constant 0 : i32
    %c0_i32_0 = arith.constant 0 : i32
    %c0_i32_1 = arith.constant 0 : i32
    return %c0_i32, %c0_i32_0 : i32, i32
  }
  func.func @transform_4(%arg0: i32) -> (i32, i32) {
    %c0_i32 = arith.constant 0 : i32
    %c0_i32_0 = arith.constant 0 : i32
    %c0_i32_1 = arith.constant 0 : i32
    return %c0_i32, %c0_i32_0 : i32, i32
  }
  func.func @transform_5(%arg0: i32) -> (i32, i32) {
    %c0_i32 = arith.constant 0 : i32
    %c0_i32_0 = arith.constant 0 : i32
    return %arg0, %c0_i32 : i32, i32
  }
  func.func @transform_6(%arg0: i32) -> (i32, i32) {
    %c0_i32 = arith.constant 0 : i32
    %c0_i32_0 = arith.constant 0 : i32
    return %arg0, %c0_i32 : i32, i32
  }
}

</mosaic_0001>

<bundles_post_ra>
// kernel: discrete_policy_forward.1
= control target key start
LH: loop header
LB: loop body
LE: loop exit
PB: predicated region body
PF: predicated region fallthrough
CT: control target
= control target key end

     0   :  { %12 = vsyncpa [#allocation3], 0  ;;  %s376_s0 = inlined_call_operand.hbm [shape: f32[8,16], index: 0, kind: input, shape index: {}]   ;;  %s377_s1 = inlined_call_operand.vmem [shape: f32[16,32], index: 1, kind: input, shape index: {}]   ;;  %s378_s2 = inlined_call_operand.vmem [shape: f32[32,32], index: 2, kind: input, shape index: {}]   ;;  %s379_s3 = inlined_call_operand.vmem [shape: f32[32,8], index: 3, kind: input, shape index: {}]   ;;  %s380_s4 = inlined_call_operand.vmem [shape: f32[1,72], index: 4, kind: input, shape index: {}]   ;;  %s381_s5 = inlined_call_operand.hbm [shape: f32[8,8], index: 5, kind: output, shape index: {0}]   ;;  %s382_s6 = inlined_call_operand.hbm [shape: f32[8,8], index: 6, kind: output, shape index: {1}]  }
   0x1   :  { %13 = vsyncpa [#allocation4], 0 }
   0x2   :  { %14 = vsyncpa [#allocation7], 0  ;;  %s20_s23 = sshll.u32 %s376_s0, 4  ;;  %s290_s24 = smov [#allocation2]   ;;  %s21_s23 = int_to_ptr.hbm [resolvable:$true] %s20_s23 }
   0x3   :  { %s22_s25 = sshll.u32 %s290_s24, 4  ;;  %s23_s25 = int_to_ptr.vmem [resolvable:$true] %s22_s25 }
   0x4   :  { %25 = dma.hbm_to_vmem [thread:$0]  %s21_s23, 128, %s23_s25, [#allocation3]  }
   0x5   :  { %284 = dma.done.wait [#allocation3], 128  }
   0x6   :  { %285 = vsyncadd [#allocation3], 4294967168  ;;  %v41_v0 = vld [vmem:[%s377_s1 + $0x8] sm:$0xff]  ;;  %v40_v1 = vld [vmem:[%s377_s1] sm:$0xff]  ;;  %vm45_vm0 = vcmask 130048   ;;  %s291_s9 = smov 96  }
   0x7   :  { %63 = vmatpush.msra.mxu0 %v41_v0  ;;  %v39_v2 = vld [vmem:[#allocation2] sm:$0xff]  ;;  %v73_v3 = vld [vmem:[%s378_s2 + $0x18] sm:$0xff]  ;;  %v72_v5 = vld [vmem:[%s378_s2 + $0x10] sm:$0xff]  ;;  %vm77_vm1 = vcmask 261120   ;;  %s292_s18 = smov 64   ;;  %vm133_vm2 = vcmask 64512  }
   0x8   :  { %93 = vmatpush.msra.mxu1 %v73_v3  ;;  %v205_v4 = vld [vmem:[%s380_s4] ss:$0 sm:$0xff]  ;;  %v71_v6 = vld [vmem:[%s378_s2 + $0x8] sm:$0xff]  ;;  %v105_v8 = vld [vmem:[%s379_s3 + $0x18] sm:$0xff]  ;;  %s171_s25 = sshll.u32 %s381_s5, 4  ;;  %s294_s26 = smov [#allocation6]   ;;  %s172_s25 = int_to_ptr.hbm [resolvable:$true] %s171_s25 }
   0x9   :  { %64 = vmatpush.msra.mxu0 %v40_v1  ;;  %74 = vrot.lane.b32.xlu0 %v205_v4, %s291_s9  ;;  %v70_v7 = vld [vmem:[%s378_s2] sm:$0xff]  ;;  %v104_v9 = vld [vmem:[%s379_s3 + $0x10] sm:$0xff]  ;;  %v103_v13 = vld [vmem:[%s379_s3 + $0x8] sm:$0xff]  ;;  %s180_s27 = sshll.u32 %s294_s26, 4  ;;  %s182_s29 = sshll.u32 %s382_s6, 4  ;;  %s181_s27 = int_to_ptr.vmem [resolvable:$true] %s180_s27  ;;  %s183_s29 = int_to_ptr.hbm [resolvable:$true] %s182_s29 }
   0xa   :  { %197 = vmatmul.msk.f32.vlgmr.msra.gmra.mxu0 %vm45_vm0, %v39_v2  ;;  %94 = vmatpush.msra.mxu1 %v72_v5  ;;  %v102_v14 = vld [vmem:[%s379_s3] sm:$0xff]  ;;  %s293_s3 = smov [#allocation5]  }
   0xb   :  { %124 = vmatpush.msra.mxu2 %v105_v8  ;;  %s169_s22 = sshll.u32 %s293_s3, 4  ;;  %s170_s22 = int_to_ptr.vmem [resolvable:$true] %s169_s22 }
   0xc   :  { %95 = vmatpush.msra.mxu1 %v71_v6 }
   0xd   :  { %125 = vmatpush.msra.mxu2 %v104_v9 }
   0xe   :  { %96 = vmatpush.msra.mxu1 %v70_v7 }
   0xf   :  { %126 = vmatpush.msra.mxu2 %v103_v13 }
  0x11   :  { %106 = vrot.lane.b32.xlu0 %v205_v4, %s292_s18  ;;  %127 = vmatpush.msra.mxu2 %v102_v14 }
  0x7b   :  { %v75_v15 = vpop.permute.xlu0 %74 }
  0x83   :  { %v107_v19 = vpop.permute.xlu0 %106 }
  0x87   :  { %v66_v10 = vpop.f32.mrf.mxu0 }
  0x88   :  { %v67_v11 = vadd.f32 %v205_v4, %v66_v10 }
  0x8a   :  { %v69_v12 = vmax.f32 %v67_v11, 0.0 }
  0x8c   :  { %198 = vmatmul.msk.f32.vlgmr.msra.gmra.mxu1 %vm77_vm1, %v69_v12 }
 0x109   :  { %v98_v16 = vpop.f32.mrf.mxu1 }
 0x10a   :  { %v99_v17 = vadd.f32 %v98_v16, %v75_v15 }
 0x10c   :  { %v101_v18 = vmax.f32 %v99_v17, 0.0 }
 0x10e   :  { %199 = vmatmul.msk.f32.vlgmr.msra.gmra.mxu2 %vm77_vm1, %v101_v18 }
 0x191   :  { %v129_v20 = vpop.f32.mrf.mxu2 }
 0x192   :  { %v130_v21 = vadd.f32 %v129_v20, %v107_v19 }
 0x194   :  { %v132_v22 = vmax.f32 %v130_v21, 0.0 }
 0x196   :  { %v134_v23 = vsel %vm133_vm2, %v132_v22, -inf }
 0x197   :  { %135 = vmax.xlane.f32.xlu1 %v134_v23 }
 0x20a   :  { %v136_v24 = vpop.xlane.xlu1 %135 }
 0x20b   :  { %v137_v25 = vsub.f32 %v132_v22, %v136_v24 }
 0x20d   :  { %v138_v26 = vmul.f32 1.442695, %v137_v25 }
 0x20f   :  { %206 = vpow2.f32 %v138_v26 }
 0x215   :  { %v207_v27 = vpop.eup %206 }
 0x216   :  { %v140_v28 = vsel %vm133_vm2, %v207_v27, 0.0 }
 0x217   :  { %141 = vadd.xlane.f32.xlu1 %v140_v28 }
 0x28a   :  { %v142_v29 = vpop.xlane.xlu1 %141 }
 0x28b   :  { %208 = vrcp.f32 %v142_v29  ;;  %v154_v35 = vand.u32 2147483648, %v142_v29  ;;  %v152_v38 = vand.u32 2147483647, %v142_v29  ;;  %vm148_vm4 = vweird.f32 %v142_v29 }
 0x28c   :  { %210 = vlog2.f32 %v142_v29 }
 0x28d   :  { %v155_v40 = vor.u32 1.1754944e-38, %v154_v35  ;;  %vm153_vm6 = vcmp.eq.f32.partialorder %v152_v38, 8.507059e+37 }
 0x291   :  { %v209_v30 = vpop.eup %208 }
 0x292   :  { %v211_v31 = vpop.eup %210  ;;  %v144_v32 = vmul.f32 %v209_v30, %v142_v29  ;;  %vm149_vm3 = vweird.f32 %v209_v30 }
 0x293   :  { %v159_v33 = vmul.f32 0.6931472, %v211_v31  ;;  %vm150_vm5 = vmor %vm148_vm4, %vm149_vm3 }
 0x294   :  { %v145_v34 = vsub.f32 1.0, %v144_v32 }
 0x295   :  { %v160_v36 = vsub.f32 %v137_v25, %v159_v33 }
 0x296   :  { %v146_v37 = vmul.f32 %v209_v30, %v145_v34 }
 0x297   :  { %161 = vst.msk [vmem:[#allocation5] sm:$0xff] %vm133_vm2, %v160_v36 }
 0x298   :  { %v147_v39 = vadd.f32 %v209_v30, %v146_v37  ;;  %174 = dma.vmem_to_hbm [thread:$0]  %s170_s22, 128, %s172_s25, [#allocation4]  }
 0x29a   :  { %v151_v41 = vsel %vm150_vm5, %v209_v30, %v147_v39 }
 0x29b   :  { %v156_v42 = vsel %vm153_vm6, %v155_v40, %v151_v41 }
 0x29c   :  { %v162_v43 = vmul.f32 %v207_v27, %v156_v42 }
 0x29e   :  { %163 = vst.msk [vmem:[#allocation6] sm:$0xff] %vm133_vm2, %v162_v43 }
 0x29f   :  { %185 = dma.vmem_to_hbm [thread:$0]  %s181_s27, 128, %s183_s29, [#allocation7]  }
 0x2a0   :  { %286 = dma.done.wait [#allocation4], 128  }
 0x2a1   :  { %287 = vsyncadd [#allocation4], 4294967168 }
 0x2a2   :  { %288 = dma.done.wait [#allocation7], 128  }
 0x2a3   :  { %289 = vsyncadd [#allocation7], 4294967168 }
 0x2a4   :  { %194 = vsyncpa [#allocation3], 1 }
 0x2a5   :  { %195 = vsyncpa [#allocation4], 1 }
 0x2a6   :  { %196 = vsyncpa [#allocation7], 1 }

</bundles_post_ra>
